<compile_context>
chip_gen: v7x
topology: tpu7x:2x2x1
jax: 0.10.0
libtpu: 0.0.40
codegen_flags: <defaults>
</compile_context>

<pallas_src>
import functools

import jax
import jax.numpy as jnp
from jax.experimental import pallas as pl
from jax.experimental.pallas import tpu as pltpu

_VMEM_LIMIT_BYTES = 48 * 1024 * 1024


def _round_up(x, m):
    return ((x + m - 1) // m) * m


def _choose_tile_n(n, d):
    """Row-tile size: as large as a conservative (v7x-safe) VMEM budget allows."""
    n8 = _round_up(max(int(n), 1), 8)
    # The streaming context pass holds ~2x(feats tile) + 2x(ctx tile) in f32
    # (double-buffered) -> ~16 * TN * D bytes.  Keep it under ~16 MiB.
    budget_bytes = 16 * 1024 * 1024
    tn = budget_bytes // (16 * max(int(d), 1))
    tn = max(8, (tn // 8) * 8)
    return int(min(tn, 1024, n8))


def _stats_kernel(n_rows, feat_ref, wt_ref, b_ref, outc_ref, stat_ref):
    """Per row-tile: out_c = feats @ Wt + b, per-row exp-sum (tile-local max), tile max."""
    tn = feat_ref.shape[0]
    feats = feat_ref[...]                                              # (TN, D) f32
    out_c = jnp.dot(feats, wt_ref[...],
                    preferred_element_type=jnp.float32) + b_ref[...]   # (TN, C)
    outc_ref[...] = out_c

    # Mask rows past N (the tail tile reads padded/undefined rows).
    row = jax.lax.broadcasted_iota(jnp.int32, (tn, 1), 0)
    valid = (pl.program_id(0) * tn + row) < n_rows                     # (TN, 1)
    oc = jnp.where(valid, out_c, -jnp.inf)                             # (TN, C)

    m_t = jnp.max(oc, keepdims=True)                                   # (1, 1) tile max
    rs = jnp.sum(jnp.exp(oc - m_t), axis=1, keepdims=True)             # (TN, 1); masked rows -> 0

    # stat[:, 0] = local per-row exp-sum, stat[:, 1] = tile max; single dense store.
    col = jax.lax.broadcasted_iota(jnp.int32, (tn, 2), 1)
    stat_ref[...] = jnp.where(col == 0,
                              jnp.broadcast_to(rs, (tn, 2)),
                              jnp.broadcast_to(m_t, (tn, 2)))


def _context_kernel(feat_ref, alpha_ref, ctx_ref):
    # context tile = features tile * (N * alpha) broadcast over the feature dim.
    ctx_ref[...] = feat_ref[...] * alpha_ref[...]


def attention_layer(features, W_1, b_1, flag=1, tile_n=None):
    """Pallas implementation of AttentionLayer.forward (flag == 1 hot path)."""
    features = jnp.asarray(features, jnp.float32)
    W_1 = jnp.asarray(W_1, jnp.float32)
    b_1 = jnp.asarray(b_1, jnp.float32)
    n, d = features.shape
    c = W_1.shape[0]

    if flag != 1:
        # TODO(synk): the PyTorch reference leaves `out_c` undefined on this branch
        # (it would raise); zeros are returned for out_c instead.
        return features, jnp.zeros((n, c), jnp.float32), jnp.zeros((n,), jnp.float32)

    wt = W_1.T                      # (D, C): kernel does a plain (TN,D)@(D,C) matmul
    b2 = b_1.reshape(1, c)

    tn = int(tile_n) if tile_n is not None else _choose_tile_n(n, d)
    tn = max(8, _round_up(tn, 8))
    num_tiles = pl.cdiv(n, tn)
    n_pad = num_tiles * tn

    compiler_params = pltpu.CompilerParams(
        dimension_semantics=("parallel",),      # v7x: shard row tiles across the 2 TCs
        vmem_limit_bytes=_VMEM_LIMIT_BYTES,
    )

    # ---- Pass 1: linear + per-tile softmax statistics (streamed over row tiles).
    out_c, stats = pl.pallas_call(
        functools.partial(_stats_kernel, n),
        out_shape=(
            jax.ShapeDtypeStruct((n, c), jnp.float32),
            jax.ShapeDtypeStruct((n_pad, 2), jnp.float32),
        ),
        grid=(num_tiles,),
        in_specs=[
            pl.BlockSpec((tn, d), lambda i: (i, 0)),
            pl.BlockSpec((d, c), lambda i: (0, 0)),
            pl.BlockSpec((1, c), lambda i: (0, 0)),
        ],
        out_specs=(
            pl.BlockSpec((tn, c), lambda i: (i, 0)),
            pl.BlockSpec((tn, 2), lambda i: (i, 0)),
        ),
        compiler_params=compiler_params,
    )(features, wt, b2)

    # ---- Tiny cross-tile combine (a few KB of data; XLA fuses this trivially).
    rs_local = stats[:, 0:1]                       # per-row sum_j exp(out_c - tile_max)
    m_local = stats[:, 1:2]                        # tile max, broadcast per row
    m_global = jnp.max(m_local)
    row_sum = rs_local * jnp.exp(m_local - m_global)   # == sum_j exp(out_c - global_max)
    total = jnp.sum(row_sum)                           # padded rows contribute 0
    alpha_pad = row_sum / total                        # (N_pad, 1)
    alpha = alpha_pad[:n, 0]                           # (N,)  == torch.squeeze(alpha)
    alpha_n = alpha_pad * jnp.float32(n)               # N * alpha, per row

    # ---- Pass 2: context = features * (N * alpha), streamed over row tiles.
    context = pl.pallas_call(
        _context_kernel,
        out_shape=jax.ShapeDtypeStruct((n, d), jnp.float32),
        grid=(num_tiles,),
        in_specs=[
            pl.BlockSpec((tn, d), lambda i: (i, 0)),
            pl.BlockSpec((tn, 1), lambda i: (i, 0)),
        ],
        out_specs=pl.BlockSpec((tn, d), lambda i: (i, 0)),
        compiler_params=compiler_params,
    )(features, alpha_n)

    return context, out_c, alpha


def _reference(features, W_1, b_1):
    out_c = features @ W_1.T + b_1
    out = jnp.exp(out_c - jnp.max(out_c))
    out = jnp.sum(out, axis=1, keepdims=True)
    alpha = out / jnp.sum(out, axis=0)
    alpha01 = features.shape[0] * jnp.broadcast_to(alpha, features.shape)
    context = features * alpha01
    return context, out_c, jnp.squeeze(alpha)


if __name__ == "__main__":
    key = jax.random.PRNGKey(0)
    k1, k2, k3, k4, k5 = jax.random.split(key, 5)

    # Case 1: small shapes consistent with the module.
    N, DIM, NUM_CLASSES = 8, 32, 4
    features = jax.random.normal(k1, (N, DIM), jnp.float32)
    W_1 = jax.random.normal(k2, (NUM_CLASSES, DIM), jnp.float32) * 0.1
    b_1 = jax.random.normal(k3, (NUM_CLASSES,), jnp.float32) * 0.1

    ctx, out_c, alpha = attention_layer(features, W_1, b_1, flag=1)
    jax.block_until_ready((ctx, out_c, alpha))
    ctx_r, out_c_r, alpha_r = _reference(features, W_1, b_1)
    assert jnp.allclose(out_c, out_c_r, atol=1e-4, rtol=1e-4)
    assert jnp.allclose(alpha, alpha_r, atol=1e-5, rtol=1e-4)
    assert jnp.allclose(ctx, ctx_r, atol=1e-4, rtol=1e-4)

    # Case 2: N not a multiple of the row tile -> exercises multi-tile streaming
    # and tail-row masking.
    N2, D2 = 20, 128
    features2 = jax.random.normal(k4, (N2, D2), jnp.float32)
    W_2 = jax.random.normal(k5, (NUM_CLASSES, D2), jnp.float32) * 0.1
    ctx2, out_c2, alpha2 = attention_layer(features2, W_2, b_1, flag=1, tile_n=8)
    jax.block_until_ready((ctx2, out_c2, alpha2))
    ctx2_r, out_c2_r, alpha2_r = _reference(features2, W_2, b_1)
    assert jnp.allclose(out_c2, out_c2_r, atol=1e-4, rtol=1e-4)
    assert jnp.allclose(alpha2, alpha2_r, atol=1e-5, rtol=1e-4)
    assert jnp.allclose(ctx2, ctx2_r, atol=1e-4, rtol=1e-4)

    print("KERNEL_OK")
</pallas_src>

<mosaic_0001>
module attributes {stable_mosaic.version = 11 : i64} {
  func.func @_stats_kernel(%arg0: i32, %arg1: memref<8x32xf32, #tpu.memory_space<vmem>>, %arg2: memref<32x4xf32, #tpu.memory_space<vmem>>, %arg3: memref<1x4xf32, #tpu.memory_space<vmem>>, %arg4: memref<8x4xf32, #tpu.memory_space<vmem>>, %arg5: memref<8x2xf32, #tpu.memory_space<vmem>>) attributes {dimension_semantics = [#tpu.dimension_semantics<parallel>], iteration_bounds = array<i64: 1>, scalar_prefetch = 0 : i64, scratch_operands = 0 : i64, tpu.core_type = #tpu.core_type<tc>, window_params = [{transform_indices = @transform_0, window_bounds = array<i64: 8, 32>}, {pipeline_mode = #tpu.pipeline_mode<synchronous>, transform_indices = @transform_1, window_bounds = array<i64: 32, 4>}, {pipeline_mode = #tpu.pipeline_mode<synchronous>, transform_indices = @transform_2, window_bounds = array<i64: 1, 4>}, {transform_indices = @transform_3, window_bounds = array<i64: 8, 4>}, {transform_indices = @transform_4, window_bounds = array<i64: 8, 2>}]} {
    %c0 = arith.constant 0 : index
    %c0_0 = arith.constant 0 : index
    %0 = vector.load %arg1[%c0, %c0_0] : memref<8x32xf32, #tpu.memory_space<vmem>>, vector<8x32xf32>
    %c0_1 = arith.constant 0 : index
    %c0_2 = arith.constant 0 : index
    %1 = vector.load %arg2[%c0_1, %c0_2] : memref<32x4xf32, #tpu.memory_space<vmem>>, vector<32x4xf32>
    %cst = arith.constant dense<0.000000e+00> : vector<8x4xf32>
    %2 = tpu.matmul %0, %1, %cst {dimension_numbers = #tpu.dot_dimension_numbers<[1], [0], [0], [1], [0, 0, 1, 1], [], []>} : vector<8x32xf32>, vector<32x4xf32>, vector<8x4xf32> -> vector<8x4xf32>
    %c0_3 = arith.constant 0 : index
    %c0_4 = arith.constant 0 : index
    %3 = vector.load %arg3[%c0_3, %c0_4] : memref<1x4xf32, #tpu.memory_space<vmem>>, vector<1x4xf32>
    %4 = vector.broadcast %3 : vector<1x4xf32> to vector<8x4xf32>
    %5 = arith.addf %2, %4 : vector<8x4xf32>
    %c0_5 = arith.constant 0 : index
    %c0_6 = arith.constant 0 : index
    %6 = vector.load %arg4[%c0_5, %c0_6] : memref<8x4xf32, #tpu.memory_space<vmem>>, vector<8x4xf32>
    tpu.vector_store %arg4[%c0_5, %c0_6], %5 {strides = array<i32>} : memref<8x4xf32, #tpu.memory_space<vmem>>, vector<8x4xf32>,
    %7 = tpu.iota {dimensions = array<i32: 0>} : vector<8x1xi32>
    %c8_i32 = arith.constant 8 : i32
    %8 = arith.muli %arg0, %c8_i32 : i32
    %9 = vector.broadcast %8 : i32 to vector<8x1xi32>
    %10 = arith.addi %9, %7 : vector<8x1xi32>
    %c8_i32_7 = arith.constant 8 : i32
    %11 = vector.broadcast %c8_i32_7 : i32 to vector<8x1xi32>
    %12 = arith.cmpi slt, %10, %11 : vector<8x1xi32>
    %cst_8 = arith.constant 0xFF800000 : f32
    %13 = vector.shape_cast %12 : vector<8x1xi1> to vector<8x1xi1>
    %14 = vector.broadcast %13 : vector<8x1xi1> to vector<8x4xi1>
    %15 = vector.broadcast %cst_8 : f32 to vector<8x4xf32>
    %16 = arith.select %14, %5, %15 : vector<8x4xi1>, vector<8x4xf32>
    %17 = vector.shape_cast %16 : vector<8x4xf32> to vector<1x8x4xf32>
    %cst_9 = arith.constant dense<0xFF800000> : vector<1xf32>
    %18 = vector.multi_reduction <maximumf>, %17, %cst_9 [1, 2] : vector<1x8x4xf32> to vector<1xf32>
    %19 = vector.shape_cast %18 : vector<1xf32> to vector<1x1x1xf32>
    %20 = vector.extract %19[0, 0, 0] : f32 from vector<1x1x1xf32>
    %21 = vector.broadcast %20 : f32 to vector<1x1xf32>
    %22 = vector.broadcast %21 : vector<1x1xf32> to vector<8x4xf32>
    %23 = arith.subf %16, %22 : vector<8x4xf32>
    %24 = math.exp %23 : vector<8x4xf32>
    %cst_10 = arith.constant dense<0.000000e+00> : vector<8xf32>
    %25 = vector.multi_reduction <add>, %24, %cst_10 [1] : vector<8x4xf32> to vector<8xf32>
    %26 = vector.shape_cast %25 : vector<8xf32> to vector<8x1xf32>
    %27 = tpu.iota {dimensions = array<i32: 1>} : vector<8x2xi32>
    %c0_i32 = arith.constant 0 : i32
    %28 = vector.broadcast %c0_i32 : i32 to vector<8x2xi32>
    %29 = arith.cmpi eq, %27, %28 : vector<8x2xi32>
    %30 = vector.shape_cast %26 : vector<8x1xf32> to vector<8x1xf32>
    %31 = vector.broadcast %30 : vector<8x1xf32> to vector<8x2xf32>
    %32 = vector.shape_cast %21 : vector<1x1xf32> to vector<1x1xf32>
    %33 = vector.broadcast %32 : vector<1x1xf32> to vector<8x2xf32>
    %34 = arith.select %29, %31, %33 : vector<8x2xi1>, vector<8x2xf32>
    %c0_11 = arith.constant 0 : index
    %c0_12 = arith.constant 0 : index
    %35 = vector.load %arg5[%c0_11, %c0_12] : memref<8x2xf32, #tpu.memory_space<vmem>>, vector<8x2xf32>
    tpu.vector_store %arg5[%c0_11, %c0_12], %34 {strides = array<i32>} : memref<8x2xf32, #tpu.memory_space<vmem>>, vector<8x2xf32>,
    return
  }
  func.func @transform_0(%arg0: i32) -> (i32, i32) {
    %c0_i32 = arith.constant 0 : i32
    %c0_i32_0 = arith.constant 0 : i32
    return %arg0, %c0_i32 : i32, i32
  }
  func.func @transform_1(%arg0: i32) -> (i32, i32) {
    %c0_i32 = arith.constant 0 : i32
    %c0_i32_0 = arith.constant 0 : i32
    %c0_i32_1 = arith.constant 0 : i32
    return %c0_i32, %c0_i32_0 : i32, i32
  }
  func.func @transform_2(%arg0: i32) -> (i32, i32) {
    %c0_i32 = arith.constant 0 : i32
    %c0_i32_0 = arith.constant 0 : i32
    %c0_i32_1 = arith.constant 0 : i32
    return %c0_i32, %c0_i32_0 : i32, i32
  }
  func.func @transform_3(%arg0: i32) -> (i32, i32) {
    %c0_i32 = arith.constant 0 : i32
    %c0_i32_0 = arith.constant 0 : i32
    return %arg0, %c0_i32 : i32, i32
  }
  func.func @transform_4(%arg0: i32) -> (i32, i32) {
    %c0_i32 = arith.constant 0 : i32
    %c0_i32_0 = arith.constant 0 : i32
    return %arg0, %c0_i32 : i32, i32
  }
}

</mosaic_0001>

<bundles_post_ra>
// kernel: tpu_custom_call.1
= control target key start
LH: loop header
LB: loop body
LE: loop exit
PB: predicated region body
PF: predicated region fallthrough
CT: control target
= control target key end

     0   :  { %v175_v0 = vmov 0.0|0.0   ;;  %vm176_vm0 = vmmov 0   ;;  %v177_v4 = vmov 0.0   ;;  %vm28_vm1 = vcmask 261120   ;;  %s230_s1 = inlined_call_operand.vmem [shape: f32[32,4], index: 1, kind: input, shape index: {}]   ;;  %s231_s0 = inlined_call_operand.vmem [shape: f32[8,32], index: 0, kind: input, shape index: {}]   ;;  %s232_s2 = inlined_call_operand.vmem [shape: f32[1,4], index: 2, kind: input, shape index: {}]   ;;  %s233_s3 = inlined_call_operand.vmem [shape: f32[8,4], index: 3, kind: output, shape index: {0}]   ;;  %s234_s4 = inlined_call_operand.vmem [shape: f32[8,2], index: 4, kind: output, shape index: {1}]  }
   0x1   :  { %162 = vmatprep.subr.bf16.mxu0 %v175_v0  ;;  %v17_v1 = vld [vmem:[%s230_s1] sm:$0xff]  ;;  %v18_v2 = vld [vmem:[%s230_s1 + $0x8] sm:$0xff]  ;;  %v19_v3 = vld [vmem:[%s230_s1 + $0x10] sm:$0xff]  ;;  %159 = vmatprep.mubr.msk.f32.mxu0 %vm176_vm0, %v177_v4  ;;  %vm102_vm2 = vcmask 31744   ;;  %v130_v26 = vlaneseq  ;;  %vm134_vm4 = vcmask 15360  }
   0x2   :  { %v163_v5 = vpack.c.bf16 %v18_v2, %v17_v1  ;;  %v20_v6 = vld [vmem:[%s230_s1 + $0x18] sm:$0xff]  ;;  %v16_v8 = vld [vmem:[%s231_s0] sm:$0xff] }
   0x3   :  { %v166_v7 = vpack.c.bf16 %v20_v6, %v19_v3  ;;  %v144_v9 = vld [vmem:[%s232_s2] ss:$0 sm:$0xff]  ;;  %v131_v27 = vand.u32 127, %v130_v26 }
   0x4   :  { %164 = vmatpush3.bf16.msra.mxu0 %v163_v5 }
   0x5   :  { %165 = vmatprep.subr.bf16.mxu0 %v175_v0  ;;  %vm132_vm3 = vcmp.eq.s32.totalorder %v131_v27, 0 }
   0x8   :  { %167 = vmatpush3.bf16.msra.mxu0 %v166_v7 }
   0xb   :  { %160 = vmatmul.mubr.msk.f32.vlgmr.msra.gmra.mrb[0].mxu0 %vm28_vm1, %v16_v8 }
  0xde   :  { %v98_v10 = vpop.f32.mrb[0].mxu0 }
  0xdf   :  { %v99_v11 = vadd.f32 %v144_v9, %v98_v10  ;;  %v161_v12 = vpop.f32.mrb[1].mxu0 }
  0xe1   :  { %v113_v13 = vsel %vm102_vm2, %v99_v11, -inf  ;;  %103 = vst.msk [vmem:[%s233_s3] sm:$0xff] %vm102_vm2, %v99_v11 }
  0xe2   :  { %114 = vmax.xlane.f32.xlu0 %v113_v13 }
 0x16f   :  { %v115_v14 = vpop.xlane.xlu0 %114 }
 0x170   :  { %v116_v15 = vrot.slane %v115_v14, 4 }
 0x172   :  { %v117_v16 = vmax.f32 %v115_v14, %v116_v15 }
 0x174   :  { %v118_v17 = vrot.slane %v117_v16, 2 }
 0x176   :  { %v119_v18 = vmax.f32 %v117_v16, %v118_v17 }
 0x178   :  { %v120_v19 = vrot.slane %v119_v18, 1 }
 0x17a   :  { %v121_v20 = vmax.f32 %v119_v18, %v120_v19 }
 0x17c   :  { %168 = vpush %v121_v20 }
 0x1ad   :  { %s169_s0 = spop %168 }
 0x1ae   :  { %v123_v21 = vstv %s169_s0 }
 0x1af   :  { %v124_v22 = vsub.f32 %v99_v11, %v123_v21 }
 0x1b1   :  { %v125_v23 = vmul.f32 1.442695, %v124_v22 }
 0x1b3   :  { %173 = vpow2.f32 %v125_v23 }
 0x1bd   :  { %v174_v24 = vpop.eup %173 }
 0x1be   :  { %v127_v25 = vsel %vm102_vm2, %v174_v24, 0.0 }
 0x1bf   :  { %128 = vadd.xlane.f32.xlu0 %v127_v25 }
 0x24c   :  { %v129_v28 = vpop.xlane.xlu0 %128 }
 0x24d   :  { %v133_v29 = vsel %vm132_vm3, %v129_v28, %v123_v21 }
 0x24e   :  { %135 = vst.msk [vmem:[%s234_s4] sm:$0xff] %vm134_vm4, %v133_v29 }

</bundles_post_ra>
